<compile_context>
chip_gen: v5e
topology: v5e:2x2
jax: 0.10.0
libtpu: 0.0.40
codegen_flags: <defaults>
</compile_context>

<pallas_src>
import functools

import jax
import jax.numpy as jnp
from jax.experimental import pallas as pl
from jax.experimental.pallas import tpu as pltpu


# ----------------------------------------------------------------------------
# Helpers
# ----------------------------------------------------------------------------
def _round_up(x, m):
    return ((x + m - 1) // m) * m


def _vmem_capacity_bytes():
    """Physical VMEM of the current chip; conservative 64 MiB (v7x) fallback."""
    try:
        info = pltpu.get_tpu_info()
        cap = int(getattr(info, "vmem_capacity_bytes", 0))
        if cap > 0:
            return cap
    except Exception:
        pass
    return 64 << 20


def _pick_seq_tile(seq_len, n_heads, head_dim, n_out, x_bytes, w_bytes, out_bytes,
                   budget_bytes):
    """Largest legal sequence row-tile whose VMEM footprint fits the budget."""
    lane = 128
    d_pad = _round_up(head_dim, lane)   # lane padding of the last dim in VMEM
    n_pad = _round_up(n_out, lane)

    def footprint(ts):
        x_blk = 2 * n_heads * ts * d_pad * x_bytes      # double-buffered streamed input
        w_blk = 2 * n_heads * d_pad * n_pad * w_bytes   # resident weight (conservative 2x)
        o_blk = 2 * ts * n_pad * out_bytes              # double-buffered output tile
        acc = 2 * ts * n_pad * 4                        # live f32 accumulator values
        bias = 2 * 8 * n_pad * 4
        return x_blk + w_blk + o_blk + acc + bias

    if seq_len <= 4096 and footprint(seq_len) <= budget_bytes:
        return seq_len                                   # whole sequence (always legal)
    for ts in (4096, 3072, 2048, 1536, 1024, 768, 512, 384, 256, 128, 64, 32, 16, 8):
        if ts <= seq_len and footprint(ts) <= budget_bytes:
            return ts
    return min(seq_len, 8)


# ----------------------------------------------------------------------------
# Pallas kernel: fused head-merge + linear  (y[b,s,:] = sum_h x[b,h,s,:] @ W[h] + b)
# ----------------------------------------------------------------------------
def _fused_headmerge_linear_kernel(x_ref, w_ref, b_ref, o_ref, *, n_heads):
    # x_ref: (H, ts, Dh) one row-tile of the aux cache (batch dim squeezed)
    # w_ref: (H, Dh, N)  VMEM-resident fused weight (constant index_map)
    # b_ref: (1, N)      f32 bias
    # o_ref: (ts, N)     output tile
    acc = jnp.dot(x_ref[0].astype(w_ref.dtype), w_ref[0],
                  preferred_element_type=jnp.float32)
    for h in range(1, n_heads):                 # static unroll; H is small
        acc = acc + jnp.dot(x_ref[h].astype(w_ref.dtype), w_ref[h],
                            preferred_element_type=jnp.float32)
    o_ref[...] = (acc + b_ref[...]).astype(o_ref.dtype)


def fused_headmerge_linear(x, w_t, bias, *, compute_dtype=jnp.bfloat16, out_dtype=None):
    """x: [B, H, S, Dh], w_t: [H*Dh, N] (already transposed), bias: [N] -> [B, S, N]."""
    bsz, n_heads, seq_len, head_dim = x.shape
    k_dim, n_out = w_t.shape
    assert k_dim == n_heads * head_dim, (k_dim, n_heads, head_dim)
    out_dtype = x.dtype if out_dtype is None else out_dtype

    w3 = w_t.reshape(n_heads, head_dim, n_out).astype(compute_dtype)  # per-head slices
    b2 = bias.reshape(1, n_out).astype(jnp.float32)

    x_bytes = jnp.dtype(x.dtype).itemsize
    w_bytes = jnp.dtype(compute_dtype).itemsize
    out_bytes = jnp.dtype(out_dtype).itemsize

    cap = _vmem_capacity_bytes()
    budget = int(cap * 0.60)                 # ~38 MiB on v7x, ~77 MiB on v5e/v6e
    ts = _pick_seq_tile(seq_len, n_heads, head_dim, n_out,
                        x_bytes, w_bytes, out_bytes, budget)

    # Guarantee >= 2 parallel blocks when legal so both v7x TensorCores get work.
    if bsz * pl.cdiv(seq_len, ts) < 2 and seq_len > 8:
        half = _round_up((seq_len + 1) // 2, 8)
        if 8 <= half < seq_len:
            ts = half

    grid = (bsz, pl.cdiv(seq_len, ts))
    vmem_limit = max(32 << 20, min(int(cap * 0.85), budget + (8 << 20)))

    cost = pl.CostEstimate(
        flops=2 * bsz * seq_len * k_dim * n_out,
        transcendentals=0,
        bytes_accessed=(
            bsz * n_heads * seq_len * head_dim * x_bytes   # x (read once)
            + k_dim * n_out * w_bytes                      # w (resident -> read once)
            + n_out * 4                                    # bias
            + bsz * seq_len * n_out * out_bytes            # y
        ),
    )

    kernel = functools.partial(_fused_headmerge_linear_kernel, n_heads=n_heads)

    return pl.pallas_call(
        kernel,
        out_shape=jax.ShapeDtypeStruct((bsz, seq_len, n_out), out_dtype),
        grid_spec=pltpu.PrefetchScalarGridSpec(
            num_scalar_prefetch=0,
            grid=grid,
            in_specs=[
                # aux cache [B, H, S, Dh]: all heads of one row-tile per step
                pl.BlockSpec((None, n_heads, ts, head_dim),
                             lambda bi, si: (bi, 0, si, 0)),
                # fused weight [H, Dh, N]: constant index -> fetched once, VMEM-resident
                pl.BlockSpec((n_heads, head_dim, n_out), lambda bi, si: (0, 0, 0)),
                # bias, resident
                pl.BlockSpec((1, n_out), lambda bi, si: (0, 0)),
            ],
            out_specs=pl.BlockSpec((None, ts, n_out), lambda bi, si: (bi, si, 0)),
        ),
        compiler_params=pltpu.CompilerParams(
            dimension_semantics=("parallel", "parallel"),
            vmem_limit_bytes=vmem_limit,
        ),
        cost_estimate=cost,
    )(x, w3, b2)


# ----------------------------------------------------------------------------
# KVPredicter: JAX glue around the fused Pallas linear
# ----------------------------------------------------------------------------
class KVPredicterPallas:
    def __init__(
        self,
        auxkv_num_layers_to_basekv_num_layers,
        auxiliary_k_dims,
        auxiliary_v_dims,
        base_k_dims,
        base_v_dims,
        base_k_num_heads,
        base_v_num_heads,
        *,
        key,
        param_dtype=jnp.float32,
        compute_dtype=jnp.bfloat16,
    ):
        self.layer_map = list(auxkv_num_layers_to_basekv_num_layers)
        n_aux = len(auxiliary_k_dims)
        if not all(0 <= k < n_aux for k in self.layer_map):
            raise ValueError("invalid layer mapping")
        self.compute_dtype = compute_dtype
        self.base_k_num_heads = list(base_k_num_heads)
        self.base_v_num_heads = list(base_v_num_heads)

        remapped_k_in = [auxiliary_k_dims[i] for i in self.layer_map]
        remapped_v_in = [auxiliary_v_dims[i] for i in self.layer_map]

        # Deterministic nn.Linear-style init: U(-1/sqrt(fan_in), +); weight stored
        # transposed as (in_dim, out_dim) in the compute dtype; bias kept in f32.
        def init_linear(k, in_dim, out_dim):
            kw, kb = jax.random.split(k)
            bound = 1.0 / (in_dim ** 0.5)
            w_t = jax.random.uniform(kw, (in_dim, out_dim), param_dtype, -bound, bound)
            b = jax.random.uniform(kb, (out_dim,), param_dtype, -bound, bound)
            return w_t.astype(compute_dtype), b.astype(jnp.float32)

        n_base = len(base_k_dims)
        keys = jax.random.split(key, 2 * n_base)
        self.key_transforms = [
            init_linear(keys[2 * i], remapped_k_in[i], base_k_dims[i]) for i in range(n_base)
        ]
        self.value_transforms = [
            init_linear(keys[2 * i + 1], remapped_v_in[i], base_v_dims[i]) for i in range(n_base)
        ]

        # Fuse base layers that read the same aux layer into one wide matmul.  Each
        # layer's output width is padded to a multiple of 128 so the fused stores are
        # lane-dense and the per-layer slices below start at lane-aligned offsets.
        # Groups are chunked so the resident bf16 weight stays comfortably in VMEM.
        def build_groups(transforms, num_heads, max_w_bytes=16 << 20):
            w_itemsize = jnp.dtype(compute_dtype).itemsize
            by_aux = {}
            for bid, aux_idx in enumerate(self.layer_map):
                by_aux.setdefault(aux_idx, []).append(bid)
            groups = []
            for aux_idx, bids in by_aux.items():
                chunks, cur, cur_bytes = [], [], 0
                for bid in bids:
                    w_t, _ = transforms[bid]
                    in_dim, out_dim = int(w_t.shape[0]), int(w_t.shape[1])
                    nbytes = in_dim * _round_up(out_dim, 128) * w_itemsize
                    if cur and cur_bytes + nbytes > max_w_bytes:
                        chunks.append(cur)
                        cur, cur_bytes = [], 0
                    cur.append(bid)
                    cur_bytes += nbytes
                if cur:
                    chunks.append(cur)
                for chunk in chunks:
                    w_parts, b_parts, parts = [], [], []
                    for bid in chunk:
                        w_t, b = transforms[bid]
                        out_dim = int(w_t.shape[1])
                        n_pad = _round_up(out_dim, 128)
                        pad = n_pad - out_dim
                        w_parts.append(jnp.pad(w_t, ((0, 0), (0, pad))) if pad else w_t)
                        b_parts.append(jnp.pad(b, (0, pad)) if pad else b)
                        parts.append((bid, out_dim, n_pad, num_heads[bid]))
                    groups.append((aux_idx,
                                   jnp.concatenate(w_parts, axis=1),
                                   jnp.concatenate(b_parts, axis=0),
                                   parts))
            return groups

        self.key_groups = build_groups(self.key_transforms, self.base_k_num_heads)
        self.value_groups = build_groups(self.value_transforms, self.base_v_num_heads)

    def _run_groups(self, caches, groups, out_slots):
        for aux_idx, w_fused, b_fused, parts in groups:
            x = caches[aux_idx]  # [B, H, S, Dh]
            y = fused_headmerge_linear(x, w_fused, b_fused,
                                       compute_dtype=self.compute_dtype)
            bsz, seq_len, _ = y.shape
            off = 0
            for bid, n_out, n_pad, heads in parts:
                yi = y[..., off:off + n_out]          # lane-aligned start (off % 128 == 0)
                off += n_pad
                yi = yi.reshape(bsz, seq_len, heads, n_out // heads)
                # TODO(synk): for base head dims that are multiples of 128 the head-major
                # [B,H_out,S,dh] layout could be stored directly from the kernel; for the
                # small head dims here that store would be lane-sparse, so the final
                # permute stays in XLA.
                out_slots[bid] = jnp.transpose(yi, (0, 2, 1, 3))

    def __call__(self, auxiliary_outputs):
        past_keys = auxiliary_outputs["past_keys"]
        past_values = auxiliary_outputs["past_values"]
        n_base = len(self.layer_map)
        pred_keys = [None] * n_base
        pred_values = [None] * n_base
        self._run_groups(past_keys, self.key_groups, pred_keys)
        self._run_groups(past_values, self.value_groups, pred_values)
        return (pred_keys, pred_values)


# ----------------------------------------------------------------------------
# Reference (pure jnp, same compute dtype) for verification
# ----------------------------------------------------------------------------
def reference_forward(model: KVPredicterPallas, auxiliary_outputs):
    def xform(cache, w_t, bias, heads):
        bsz, h, s, d = cache.shape
        x = jnp.transpose(cache, (0, 2, 1, 3)).reshape(bsz, s, h * d)
        y = jnp.dot(x.astype(w_t.dtype), w_t, preferred_element_type=jnp.float32)
        y = (y + bias.astype(jnp.float32)).astype(cache.dtype)
        y = y.reshape(bsz, s, heads, -1)
        return jnp.transpose(y, (0, 2, 1, 3))

    pk = [auxiliary_outputs["past_keys"][i] for i in model.layer_map]
    pv = [auxiliary_outputs["past_values"][i] for i in model.layer_map]
    rk = [xform(c, w, b, nh)
          for c, (w, b), nh in zip(pk, model.key_transforms, model.base_k_num_heads)]
    rv = [xform(c, w, b, nh)
          for c, (w, b), nh in zip(pv, model.value_transforms, model.base_v_num_heads)]
    return (rk, rv)


# ----------------------------------------------------------------------------
# Demo
# ----------------------------------------------------------------------------
if __name__ == "__main__":
    key = jax.random.PRNGKey(0)
    k_params, k_keys, k_vals, k_logits = jax.random.split(key, 4)

    # Small synthetic configuration.
    batch = 2
    seq = 8
    num_aux_layers = 2
    num_base_layers = 3
    aux_k_heads, aux_k_head_dim = 2, 16     # aux merged K dim = 32
    aux_v_heads, aux_v_head_dim = 2, 16     # aux merged V dim = 32
    base_k_heads, base_k_head_dim = 4, 16   # base merged K dim = 64
    base_v_heads, base_v_head_dim = 2, 32   # base merged V dim = 64

    layer_map = [0, 1, 1]  # base layer i <- aux layer layer_map[i] (layers 1,2 fuse)
    auxiliary_k_dims = [aux_k_heads * aux_k_head_dim] * num_aux_layers
    auxiliary_v_dims = [aux_v_heads * aux_v_head_dim] * num_aux_layers
    base_k_dims = [base_k_heads * base_k_head_dim] * num_base_layers
    base_v_dims = [base_v_heads * base_v_head_dim] * num_base_layers
    base_k_num_heads = [base_k_heads] * num_base_layers
    base_v_num_heads = [base_v_heads] * num_base_layers

    model = KVPredicterPallas(
        layer_map,
        auxiliary_k_dims,
        auxiliary_v_dims,
        base_k_dims,
        base_v_dims,
        base_k_num_heads,
        base_v_num_heads,
        key=k_params,
    )

    # Synthetic auxiliary model outputs.
    key_keys = jax.random.split(k_keys, num_aux_layers)
    key_vals = jax.random.split(k_vals, num_aux_layers)
    past_keys = [
        jax.random.normal(key_keys[i], (batch, aux_k_heads, seq, aux_k_head_dim), jnp.float32)
        for i in range(num_aux_layers)
    ]
    past_values = [
        jax.random.normal(key_vals[i], (batch, aux_v_heads, seq, aux_v_head_dim), jnp.float32)
        for i in range(num_aux_layers)
    ]
    auxiliary_outputs = {
        "logits": jax.random.normal(k_logits, (batch, seq, 64), jnp.float32),
        "past_keys": past_keys,
        "past_values": past_values,
    }

    pred_keys, pred_values = model(auxiliary_outputs)
    jax.block_until_ready((pred_keys, pred_values))

    # Verify shapes and numerics against the (compute-dtype-matched) jnp reference.
    ref_keys, ref_values = reference_forward(model, auxiliary_outputs)
    assert len(pred_keys) == num_base_layers and len(pred_values) == num_base_layers
    for pk, rk in zip(pred_keys, ref_keys):
        assert pk.shape == (batch, base_k_heads, seq, base_k_head_dim), pk.shape
        assert jnp.allclose(pk, rk, atol=1e-3, rtol=1e-3)
    for pv, rv in zip(pred_values, ref_values):
        assert pv.shape == (batch, base_v_heads, seq, base_v_head_dim), pv.shape
        assert jnp.allclose(pv, rv, atol=1e-3, rtol=1e-3)

    print("KERNEL_OK")
</pallas_src>

<mosaic_0001>
module attributes {stable_mosaic.version = 11 : i64} {
  func.func @_fused_headmerge_linear_kernel(%arg0: i32, %arg1: i32, %arg2: memref<1x2x8x16xf32, #tpu.memory_space<vmem>>, %arg3: memref<2x16x128xbf16, #tpu.memory_space<vmem>>, %arg4: memref<1x128xf32, #tpu.memory_space<vmem>>, %arg5: memref<1x8x128xf32, #tpu.memory_space<vmem>>) attributes {dimension_semantics = [#tpu.dimension_semantics<parallel>, #tpu.dimension_semantics<parallel>], iteration_bounds = array<i64: 2, 1>, scalar_prefetch = 0 : i64, scratch_operands = 0 : i64, tpu.core_type = #tpu.core_type<tc>, window_params = [{transform_indices = @transform_0, window_bounds = array<i64: 1, 2, 8, 16>}, {pipeline_mode = #tpu.pipeline_mode<synchronous>, transform_indices = @transform_1, window_bounds = array<i64: 2, 16, 128>}, {pipeline_mode = #tpu.pipeline_mode<synchronous>, transform_indices = @transform_2, window_bounds = array<i64: 1, 128>}, {transform_indices = @transform_3, window_bounds = array<i64: 1, 8, 128>}]} {
    %c0 = arith.constant 0 : index
    %c0_0 = arith.constant 0 : index
    %c0_1 = arith.constant 0 : index
    %c0_2 = arith.constant 0 : index
    %0 = vector.load %arg2[%c0, %c0_0, %c0_1, %c0_2] : memref<1x2x8x16xf32, #tpu.memory_space<vmem>>, vector<1x1x8x16xf32>
    %1 = vector.shape_cast %0 : vector<1x1x8x16xf32> to vector<8x16xf32>
    %2 = arith.truncf %1 : vector<8x16xf32> to vector<8x16xbf16>
    %c0_3 = arith.constant 0 : index
    %c0_4 = arith.constant 0 : index
    %c0_5 = arith.constant 0 : index
    %3 = vector.load %arg3[%c0_3, %c0_4, %c0_5] : memref<2x16x128xbf16, #tpu.memory_space<vmem>>, vector<1x16x128xbf16>
    %4 = vector.shape_cast %3 : vector<1x16x128xbf16> to vector<16x128xbf16>
    %cst = arith.constant dense<0.000000e+00> : vector<8x128xf32>
    %5 = tpu.matmul %2, %4, %cst {dimension_numbers = #tpu.dot_dimension_numbers<[1], [0], [0], [1], [0, 0, 1, 1], [], []>} : vector<8x16xbf16>, vector<16x128xbf16>, vector<8x128xf32> -> vector<8x128xf32>
    %c0_6 = arith.constant 0 : index
    %c1 = arith.constant 1 : index
    %c0_7 = arith.constant 0 : index
    %c0_8 = arith.constant 0 : index
    %6 = vector.load %arg2[%c0_6, %c1, %c0_7, %c0_8] : memref<1x2x8x16xf32, #tpu.memory_space<vmem>>, vector<1x1x8x16xf32>
    %7 = vector.shape_cast %6 : vector<1x1x8x16xf32> to vector<8x16xf32>
    %8 = arith.truncf %7 : vector<8x16xf32> to vector<8x16xbf16>
    %c1_9 = arith.constant 1 : index
    %c0_10 = arith.constant 0 : index
    %c0_11 = arith.constant 0 : index
    %9 = vector.load %arg3[%c1_9, %c0_10, %c0_11] : memref<2x16x128xbf16, #tpu.memory_space<vmem>>, vector<1x16x128xbf16>
    %10 = vector.shape_cast %9 : vector<1x16x128xbf16> to vector<16x128xbf16>
    %cst_12 = arith.constant dense<0.000000e+00> : vector<8x128xf32>
    %11 = tpu.matmul %8, %10, %cst_12 {dimension_numbers = #tpu.dot_dimension_numbers<[1], [0], [0], [1], [0, 0, 1, 1], [], []>} : vector<8x16xbf16>, vector<16x128xbf16>, vector<8x128xf32> -> vector<8x128xf32>
    %12 = arith.addf %5, %11 : vector<8x128xf32>
    %c0_13 = arith.constant 0 : index
    %c0_14 = arith.constant 0 : index
    %13 = vector.load %arg4[%c0_13, %c0_14] : memref<1x128xf32, #tpu.memory_space<vmem>>, vector<1x128xf32>
    %14 = vector.broadcast %13 : vector<1x128xf32> to vector<8x128xf32>
    %15 = arith.addf %12, %14 : vector<8x128xf32>
    %c0_15 = arith.constant 0 : index
    %c0_16 = arith.constant 0 : index
    %c0_17 = arith.constant 0 : index
    %16 = vector.load %arg5[%c0_15, %c0_16, %c0_17] : memref<1x8x128xf32, #tpu.memory_space<vmem>>, vector<1x8x128xf32>
    %17 = vector.shape_cast %16 : vector<1x8x128xf32> to vector<8x128xf32>
    %18 = vector.shape_cast %15 : vector<8x128xf32> to vector<1x8x128xf32>
    tpu.vector_store %arg5[%c0_15, %c0_16, %c0_17], %18 {strides = array<i32>} : memref<1x8x128xf32, #tpu.memory_space<vmem>>, vector<1x8x128xf32>,
    return
  }
  func.func @transform_0(%arg0: i32, %arg1: i32) -> (i32, i32, i32, i32) {
    %c0_i32 = arith.constant 0 : i32
    %c0_i32_0 = arith.constant 0 : i32
    %c0_i32_1 = arith.constant 0 : i32
    return %arg0, %c0_i32, %arg1, %c0_i32_0 : i32, i32, i32, i32
  }
  func.func @transform_1(%arg0: i32, %arg1: i32) -> (i32, i32, i32) {
    %c0_i32 = arith.constant 0 : i32
    %c0_i32_0 = arith.constant 0 : i32
    %c0_i32_1 = arith.constant 0 : i32
    %c0_i32_2 = arith.constant 0 : i32
    return %c0_i32, %c0_i32_0, %c0_i32_1 : i32, i32, i32
  }
  func.func @transform_2(%arg0: i32, %arg1: i32) -> (i32, i32) {
    %c0_i32 = arith.constant 0 : i32
    %c0_i32_0 = arith.constant 0 : i32
    %c0_i32_1 = arith.constant 0 : i32
    return %c0_i32, %c0_i32_0 : i32, i32
  }
  func.func @transform_3(%arg0: i32, %arg1: i32) -> (i32, i32, i32) {
    %c0_i32 = arith.constant 0 : i32
    %c0_i32_0 = arith.constant 0 : i32
    return %arg0, %arg1, %c0_i32 : i32, i32, i32
  }
}

</mosaic_0001>

<bundles_post_ra>
// kernel: tpu_custom_call.1
= control target key start
LH: loop header
LB: loop body
LE: loop exit
PB: predicated region body
PF: predicated region fallthrough
CT: control target
= control target key end

     0   :  { %s829_s0 = inlined_call_operand.hbm [shape: f32[2,2,8,16], index: 0, kind: input, shape index: {}]   ;;  %s830_s1 = inlined_call_operand.hbm [shape: bf16[2,16,128], index: 1, kind: input, shape index: {}]   ;;  %s831_s2 = inlined_call_operand.vmem [shape: f32[1,128], index: 2, kind: input, shape index: {}]   ;;  %s832_s3 = inlined_call_operand.hbm [shape: f32[2,8,128], index: 3, kind: output, shape index: {}]  }
   0x1   :  { %833 = sst [smem:[#allocation11_spill]] %s830_s1 }
   0x2   :  { %8 = vsyncpa [#allocation3], 0 }
   0x3   :  { %10 = vsyncpa [#allocation3 + $0x1], 0 }
   0x4   :  { %11 = vsyncpa [#allocation6], 0 }
   0x5   :  { %12 = vsyncpa [#allocation4], 0 }
   0x6   :  { %14 = vsyncpa [#allocation4 + $0x1], 0  ;;  %s676_s12 = smov 0   ;;  %s678_s13 = smov 0  }
   0x7   :  { %s680_s14 = smov 0   ;;  %s682_s15 = smov 0  }
   0x8   :  { %s684_s16 = smov 0   ;;  %s686_s17 = smov 0  }
   0x9 LB: > { %s395_s18 = sadd.s32 4294967295, %s649_s17   ;;  %s396_s19 = sadd.s32 4294967294, %s649_s17   ;;  %s649_s17 = sphi %s686_s17, %s20_s17   ;;  %s645_s16 = sphi %s684_s16, %s846_s16   ;;  %s641_s15 = sphi %s682_s15, %s845_s15   ;;  %s637_s14 = sphi %s680_s14, %s844_s14   ;;  %s633_s13 = sphi %s678_s13, %s843_s13   ;;  %s629_s12 = sphi %s676_s12, %s842_s12  }
   0xa   : > { %p54_p0 = scmp.ne.s32.totalorder %s633_s13, %s629_s12  ;;  %p710_p1 = scmp.eq.s32.totalorder %s395_s18, 0 }
   0xb   : > { %p714_p2 = scmp.eq.s32.totalorder %s395_s18, 1  ;;  %p128_p3 = scmp.eq.s32.totalorder %s396_s19, 1 }
   0xc   : > { %p720_p4 = por %p710_p1, %p54_p0  ;;  %p397_p5 = scmp.ge.s32.totalorder %s649_s17, 1 }
   0xd   : > { %p725_p6 = por %p128_p3, %p54_p0  ;;  %p135_p7 = scmp.lt.s32.totalorder %s649_s17, 3 }
   0xe   : > { %s838_s1 = sld [smem:[#allocation11_spill]]  ;;  %s651_s28 = smov [#allocation5]  }
   0xf   : > { %p733_p8 = pnand %p397_p5, %p135_p7  ;;  %s148_s29 = sshll.u32 %s651_s28, 4  ;;  %s149_s29 = int_to_ptr.vmem [resolvable:$true] %s148_s29 }
  0x10   : > { %p399_p11 = scmp.ge.s32.totalorder %s649_s17, 2  ;;  %s652_s30 = smov 64  }
  0x11   : > { %p433_p9 = pneg %p733_p8  ;;  %s653_s4 = smov 4  }
  0x12   : > { %s32_s5 = sadd.s32 1, %s645_s16  ;;  %s41_s6 = sadd.s32 1, %s637_s14 }
  0x13   : > { %p434_p10 = pnand %p433_p9, %p710_p1  ;;  %p34_p12 = scmp.ge.s32.totalorder %s32_s5, 2 }
  0x14   : > { %s146_s26 = sshll.u32 %s838_s1, 4  ;;  %p48_p13 = scmp.ne.s32.totalorder %s637_s14, %s633_s13  ;;  %s147_s26 = int_to_ptr.hbm [resolvable:$true] %s146_s26 }
  0x15   : > { %436 = dma.hbm_to_vmem [thread:$0]  (!%p434_p10), %s147_s26, 256, %s149_s29, [#allocation6], %s652_s30, %s652_s30, %s653_s4  }
  0x16   : > { %p49_p0 = scmp.eq.s32.totalorder %s649_s17, 0  ;;  %s848_s5 = smov (%p34_p12, %s32_s5), 0 }
  0x17   : > { %p755_p5 = por %p714_p2, %p48_p13  ;;  %s36_s9 = ssub.s32 %s645_s16, %s848_s5 }
  0x18   : > { %p749_p3 = por %p49_p0, %p48_p13  ;;  %p446_p7 = scmp.lt.s32.totalorder %s649_s17, 2 }
  0x19   : > { %p39_p9 = scmp.eq.s32.totalorder %s36_s9, 0  ;;  %s165_s10 = sand.u32 1, %s637_s14  }
  0x1a   : > { %s400_s11 = sshll.u32 %s165_s10, 4  ;;  %s422_s19 = sshll.u32 %s645_s16, 4 }
  0x1b   : > { %s764_s18 = scalar_select %p39_p9, %s637_s14, %s41_s6  }
  0x1c   : > { %s175_s26 = scalar_lea.hbm %s829_s0, %s422_s19  ;;  %s169_s28 = scalar_lea.vmem [#allocation2], %s400_s11 }
  0x1d   : > { %s178_s29 = sshll.u32 %s169_s28, 4  ;;  %s176_s21 = sshll.u32 %s175_s26, 4  ;;  %s179_s29 = int_to_ptr.vmem [resolvable:$true] %s178_s29  ;;  %s177_s21 = int_to_ptr.hbm [resolvable:$true] %s176_s21 }
  0x1e   : > { %p438_p2 = pnand %p446_p7, %p749_p3  ;;  %s166_s30 = scalar_lea.sflag [#allocation3], %s165_s10 }
  0x1f   : > { %s654_s4 = smov 128   ;;  %s655_s1 = smov 8  }
  0x20   : > { %440 = dma.hbm_to_vmem [thread:$0]  (!%p438_p2), %s177_s21, 256, %s179_s29, %s166_s30, %s654_s4, %s654_s4, %s655_s1  }
  0x21   : > { %190 = sbr.rel (%p733_p8) target bundleno = 179 (0xb3), region = 32  ;;  %s775_s6 = sand.u32 (!%p733_p8), 1, %s633_s13  }
  0x22   : > { %s404_s9 = sshll.u32 (!%p733_p8), %s775_s6, 4  ;;  %s193_s11 = scalar_lea.sflag (!%p733_p8), [#allocation3], %s775_s6 }
  0x23   : > { %s196_s19 = scalar_lea.vmem (!%p733_p8), [#allocation2], %s404_s9 }
  0x26   : > { %616 = dma.done.wait (%p720_p4), %s193_s11, 256  }
  0x27   : > { %618 = vsyncadd (%p720_p4), %s193_s11, 4294967040 }
  0x28   : > { %620 = dma.done.wait (%p710_p1), [#allocation6], 256  }
  0x29   : > { %622 = vsyncadd (%p710_p1), [#allocation6], 4294967040  ;;  %v424_v0 = vld [vmem:[#allocation5 + $0x8] sm:$0xff]  ;;  %v423_v1 = vld [vmem:[#allocation5] sm:$0xff]  ;;  %vm242_vm0 = vcmask 130048   ;;  %s406_s1 = sshll.u32 %s775_s6, 3 }
  0x2a   : > { %v407_v2 = vld [vmem:[%s196_s19 + $0x8] sm:$0xff]  ;;  %v226_v4 = vld [vmem:[%s196_s19] sm:$0xff]  ;;  %253 = vmatpush.bf16.msra.mxu0 %v424_v0  ;;  %275 = vmatpush.bf16.msra.mxu1 %v423_v1  ;;  %s419_s22 = sshll.u32 %s641_s15, 3  ;;  %s224_s25 = scalar_lea.vmem [#allocation7], %s406_s1 }
  0x2b   : > { %v232_v3 = vpack.c.bf16 %v407_v2, %v407_v2  ;;  %v227_v5 = vpack.c.bf16 %v226_v4, %v226_v4  ;;  %s299_s20 = scalar_lea.hbm %s832_s3, %s419_s22  ;;  %v502_v6 = vld [vmem:[%s831_s2] ss:$0 sm:$0xff]  ;;  %s301_s26 = sshll.u32 %s224_s25, 4  ;;  %s302_s26 = int_to_ptr.vmem [resolvable:$true] %s301_s26 }
  0x2c   : > { %s303_s28 = sshll.u32 %s299_s20, 4  ;;  %s288_s15 = scalar_lea.sflag [#allocation4], %s775_s6  ;;  %s304_s28 = int_to_ptr.hbm [resolvable:$true] %s303_s28 }
  0x2d   : > { %412 = vmatmul.msk.bf16.vlgmr.msra.gmra.mxu0 %vm242_vm0, %v232_v3  ;;  %417 = vmatmul.msk.bf16.vlgmr.msra.gmra.mxu1 %vm242_vm0, %v227_v5  ;;  %s577_s29 = sshra.s32 %s304_s28, 4  ;;  %s583_s9 = scalar_lea.hbm %s832_s3, 16  ;;  %s578_s29 = int_to_ptr.hbm [resolvable:$true] %s577_s29 }
  0x2e   : > { %s579_s21 = scalar_lea.hbm %s578_s29, 8  ;;  %p584_p10 = scmp.lt.s32.totalorder %s578_s29, %s832_s3 }
  0x2f   : > { %p580_p1 = scmp.ne.s32.totalorder %s578_s29, %s579_s21  ;;  %p585_p12 = scmp.lt.s32.totalorder %s583_s9, %s579_s21 }
  0x31   : > { %p581_p4 = pnand %p580_p1, %p755_p5  ;;  %p586_p13 = por %p585_p12, %p584_p10 }
  0x33   : > { %p582_p8 = pneg %p581_p4 }
  0x35   : > { %p587_p0 = pnand %p586_p13, %p582_p8 }
  0xaa   : > { %v255_v7 = vpop.f32.mrf.mxu0  ;;  %v277_v8 = vpop.f32.mrf.mxu1 }
  0xab   : > { %v278_v9 = vadd.f32 %v277_v8, %v255_v7 }
  0xad   : > { %v285_v10 = vadd.f32 %v502_v6, %v278_v9 }
  0xaf   : > { %286 = vst [vmem:[%s224_s25] sm:$0xff] %v285_v10 }
  0xb0   : > { %590 = shalt.err (!%p587_p0)
}
  0xb1   : > { %431 = dma.vmem_to_hbm [thread:$0]  (%p755_p5), %s302_s26, 128, %s304_s28, %s288_s15  }
  0xb2   : > { %v257_v11 = vpop.f32.mrf.mxu0  ;;  %v279_v12 = vpop.f32.mrf.mxu1 }
  0xb3 PF: > { %s315_s6 = sand.u32 1, %s629_s12   ;;  %p442_p3 = pnand %p399_p11, %p725_p6 }
  0xb4   : > { %s316_s1 = scalar_lea.sflag [#allocation4], %s315_s6 }
  0xb5   : > { %p443_p7 = pneg %p442_p3 }
  0xb7   : > { %624 = dma.done.wait (%p443_p7), %s316_s1, 128  }
  0xb8   : > { %626 = vsyncadd (%p443_p7), %s316_s1, 4294967168  ;;  %s20_s17 = sadd.s32 1, %s649_s17   ;;  %s842_s12 = smov %s633_s13 }
  0xb9   : > { %p17_p9 = scmp.ge.s32.totalorder %s20_s17, 4   ;;  %s843_s13 = smov %s637_s14 }
  0xba   : > { %s844_s14 = smov %s764_s18  ;;  %s845_s15 = smov %s645_s16 }
  0xbb   : > { %s846_s16 = smov %s848_s5  ;;  %19 = sbr.rel (!%p17_p9) target bundleno = 9 (0x9), region = 83 }
  0xc0   :  { %322 = vsyncpa [#allocation3], 1 }
  0xc1   :  { %324 = vsyncpa [#allocation3 + $0x1], 1 }
  0xc2   :  { %325 = vsyncpa [#allocation6], 1 }
  0xc3   :  { %326 = vsyncpa [#allocation4], 1 }
  0xc4   :  { %328 = vsyncpa [#allocation4 + $0x1], 1 }

</bundles_post_ra>
